<compile_context>
chip_gen: v6e
topology: v6e:2x2x1
jax: 0.10.0
libtpu: 0.0.40
codegen_flags: <defaults>
</compile_context>

<pallas_src>
import functools

import jax
import jax.numpy as jnp
from jax import lax
from jax.experimental import pallas as pl
from jax.experimental.pallas import tpu as pltpu

_HIGHEST = jax.lax.Precision.HIGHEST


def _make_loss_kernel(temp: float, margin: float, max_violation: bool):
    inv_temp = 1.0 / float(temp)
    margin = float(margin)

    def kernel(drow_ref, dcol_ref, s_ref,
               loss0_ref, lcol_ref, mrun_ref, cs_ref, cim_ref):
        p = pl.program_id(0)            # parallel (core) axis
        i = pl.program_id(1)            # row-tile axis within this core
        tm, batch = s_ref.shape

        @pl.when(i == 0)
        def _init():
            loss0_ref[...] = jnp.zeros_like(loss0_ref)
            lcol_ref[...] = jnp.zeros_like(lcol_ref)
            mrun_ref[...] = jnp.full_like(mrun_ref, -1e30)
            cs_ref[...] = jnp.zeros_like(cs_ref)
            cim_ref[...] = jnp.zeros_like(cim_ref)

        s = s_ref[...].astype(jnp.float32)            # (tm, B) row tile
        d_row = drow_ref[...].astype(jnp.float32)     # (1, B)   full diagonal (d2)
        d_col = dcol_ref[...].astype(jnp.float32)     # (tm, 1)  this tile's diag chunk (d1)

        ones8 = jnp.ones((8, tm), dtype=jnp.float32)  # MXU reduction helper

        # ---------------- Contrastive (hinge) ----------------
        t = s + margin                                 # shared between cost_s / cost_im
        if max_violation:
            # Mask this tile's diagonal once on the shared term; relu(-big) = 0 after.
            row0 = (p * pl.num_programs(1) + i) * tm
            gr = lax.broadcasted_iota(jnp.int32, (tm, 1), 0) + row0
            gc = lax.broadcasted_iota(jnp.int32, (1, batch), 1)
            t = jnp.where(gr == gc, -1e30, t)
            cost_s = jnp.maximum(t - d_col, 0.0)
            cost_im = jnp.maximum(t - d_row, 0.0)
            # rows are complete in a tile -> exact per-row max; columns -> running max
            cs_ref[...] += jnp.sum(jnp.max(cost_s, axis=1, keepdims=True),
                                   axis=0, keepdims=True).reshape(1, 1, 1)
            cim_ref[...] = jnp.maximum(
                cim_ref[...],
                jnp.max(cost_im, axis=0, keepdims=True).reshape(1, 1, batch))
        else:
            # Unmasked; exact diagonal term 2*B*max(margin,0) removed in the wrapper.
            cost_s = jnp.maximum(t - d_col, 0.0)
            cost_im = jnp.maximum(t - d_row, 0.0)
            cs_cols = jnp.dot(ones8, cost_s, preferred_element_type=jnp.float32,
                              precision=_HIGHEST)[0:1, :]            # (1, B) on MXU
            ci_cols = jnp.dot(ones8, cost_im, preferred_element_type=jnp.float32,
                              precision=_HIGHEST)[0:1, :]
            cs_ref[...] += cs_cols.reshape(1, 1, batch)
            cim_ref[...] += ci_cols.reshape(1, 1, batch)

        # ---------------- simCLR (cross entropy, both directions) ----------------
        # Row direction: per-row max -> exact logsumexp (row_sum >= 1, no underflow).
        m_row = jnp.max(s, axis=1, keepdims=True)                    # (tm, 1)
        e = jnp.exp((s - m_row) * inv_temp)                          # ONE EUP pass
        row_sum = jnp.sum(e, axis=1, keepdims=True)                  # (tm, 1)
        lse_row = jnp.log(row_sum) + m_row * inv_temp                # (tm, 1)
        loss0_ref[...] += jnp.sum(lse_row - d_col * inv_temp,
                                  axis=0, keepdims=True).reshape(1, 1, 1)

        # Column direction: online logsumexp with a running scalar scale; the per-row
        # rescale w folds the shared exp into the column sums, and the weighted column
        # reduction runs on the (idle) MXU.
        lm_row = m_row * inv_temp                                    # (tm, 1) logit-space row maxima
        t_max = jnp.max(lm_row, axis=0, keepdims=True)               # (1, 1)
        m_prev = mrun_ref[...].reshape(1, 1)
        m_new = jnp.maximum(m_prev, t_max)                           # (1, 1)
        w = jnp.exp(lm_row - m_new)                                  # (tm, 1)
        ec = e * w                                                   # (tm, B)
        col_part = jnp.dot(ones8, ec, preferred_element_type=jnp.float32,
                           precision=_HIGHEST)[0:1, :]               # (1, B)
        lcol = lcol_ref[...].reshape(1, batch)
        lcol_ref[...] = (lcol * jnp.exp(m_prev - m_new)
                         + col_part).reshape(1, 1, batch)
        mrun_ref[...] = m_new.reshape(1, 1, 1)

    return kernel


def _vmem_capacity_bytes() -> int:
    cap = 64 * 1024 * 1024                       # conservative fallback (v7x per-TC VMEM)
    try:
        info = pltpu.get_tpu_info()
        c = getattr(info, "vmem_capacity_bytes", None)
        if c:
            cap = int(c)
    except Exception:
        pass
    return int(min(max(cap, 32 * 1024 * 1024), 128 * 1024 * 1024))


def _pick_block_rows(batch: int, itemsize: int, block_rows):
    if block_rows is not None:
        if block_rows != batch:
            assert batch % block_rows == 0 and block_rows % 8 == 0, (
                "block_rows must divide B and be a multiple of 8")
        return block_rows
    if batch % 8 != 0:
        return batch                              # odd B: monolithic fallback
    # double-buffered input tile + ~7 live f32 full-width temporaries per tile row
    bytes_per_row = batch * (2 * itemsize + 7 * 4)
    budget = int(0.6 * _vmem_capacity_bytes())
    cap_rows = max(8, min(1024, batch, (budget // bytes_per_row) // 8 * 8))
    cand = cap_rows
    while cand >= 8:
        if batch % cand == 0:
            return cand
        cand -= 8
    return batch


@functools.partial(jax.jit,
                   static_argnames=("temp", "margin", "max_violation", "block_rows"))
def loss_sum(scores, *, temp=0.1, margin=0.2, max_violation=False, block_rows=None):
    """Pallas implementation of lossSum.forward(scores). Returns a scalar."""
    B = scores.shape[0]
    assert scores.ndim == 2 and scores.shape == (B, B), "scores must be square (B, B)"
    inv_temp = 1.0 / float(temp)

    tm = _pick_block_rows(B, scores.dtype.itemsize, block_rows)
    n_steps = B // tm
    n_par = 2 if (n_steps >= 2 and n_steps % 2 == 0) else 1
    spc = n_steps // n_par                        # row tiles per core

    # Diagonal is tiny (B elements): extract once, feed in both layouts.
    diag = jnp.diagonal(scores)
    d_row = diag.reshape(1, B)
    d_col = diag.reshape(B, 1)

    isz = scores.dtype.itemsize
    cap = _vmem_capacity_bytes()
    est = 2 * tm * B * isz + 7 * tm * B * 4 + 4 * B * 4 + (1 << 20)
    vmem_limit = int(min(0.88 * cap, max(32 * 1024 * 1024, 1.25 * est)))

    kernel = _make_loss_kernel(temp, margin, max_violation)

    cs_shape = (n_par, 1, 1) if max_violation else (n_par, 1, B)
    cs_block = (1, 1, 1) if max_violation else (1, 1, B)
    out_shapes = (
        jax.ShapeDtypeStruct((n_par, 1, 1), jnp.float32),   # row-CE partial sum
        jax.ShapeDtypeStruct((n_par, 1, B), jnp.float32),   # column exp-sum partial
        jax.ShapeDtypeStruct((n_par, 1, 1), jnp.float32),   # running column scale
        jax.ShapeDtypeStruct(cs_shape, jnp.float32),        # cost_s partial
        jax.ShapeDtypeStruct((n_par, 1, B), jnp.float32),   # cost_im partial
    )

    loss0_p, lcol_p, mrun_p, cs_p, cim_p = pl.pallas_call(
        kernel,
        out_shape=out_shapes,
        grid=(n_par, spc),
        in_specs=[
            pl.BlockSpec((1, B), lambda p, i: (0, 0)),                 # full diagonal (row layout)
            pl.BlockSpec((tm, 1), lambda p, i: (p * spc + i, 0)),      # diag chunk of this tile
            pl.BlockSpec((tm, B), lambda p, i: (p * spc + i, 0)),      # row tile of scores
        ],
        out_specs=(
            pl.BlockSpec((1, 1, 1), lambda p, i: (p, 0, 0)),
            pl.BlockSpec((1, 1, B), lambda p, i: (p, 0, 0)),
            pl.BlockSpec((1, 1, 1), lambda p, i: (p, 0, 0)),
            pl.BlockSpec(cs_block, lambda p, i: (p, 0, 0)),
            pl.BlockSpec((1, 1, B), lambda p, i: (p, 0, 0)),
        ),
        compiler_params=pltpu.CompilerParams(
            dimension_semantics=("parallel", "arbitrary"),
            vmem_limit_bytes=vmem_limit,
        ),
    )(d_row, d_col, scores)

    # ---- tiny O(B) combine in plain JAX ----
    diag_f = diag.astype(jnp.float32)

    loss0 = jnp.sum(loss0_p)
    mrun = mrun_p.reshape(n_par, 1)
    lcol = lcol_p.reshape(n_par, B)
    m_all = jnp.max(mrun, axis=0)                                   # (1,)
    lcol_tot = jnp.sum(lcol * jnp.exp(mrun - m_all), axis=0)        # (B,)
    lse_col = jnp.log(jnp.maximum(lcol_tot, 1e-30)) + m_all
    loss1 = jnp.sum(lse_col - diag_f * inv_temp)
    simclr = (loss0 + loss1) / B

    if max_violation:
        cont = jnp.sum(cs_p) + jnp.sum(jnp.max(cim_p.reshape(n_par, B), axis=0))
    else:
        cont = (jnp.sum(cs_p) + jnp.sum(cim_p)
                - 2.0 * B * max(float(margin), 0.0))   # exact diagonal correction

    return 2.0 * simclr + cont


def _reference_loss_sum(scores, temp, margin, max_violation):
    """Pure-JAX reference mirroring the PyTorch module (for verification)."""
    scores = scores.astype(jnp.float32)
    B = scores.shape[0]
    idx = jnp.arange(B)

    def ce(logits):
        lse = jax.nn.logsumexp(logits, axis=1)
        return jnp.mean(lse - logits[idx, idx])

    simclr = ce(scores / temp) + ce(scores.T / temp)

    diag = jnp.diag(scores)
    d1 = diag[:, None]
    d2 = diag[None, :]
    eye = jnp.eye(B, dtype=bool)
    cost_s = jnp.where(eye, 0.0, jnp.maximum(margin + scores - d1, 0.0))
    cost_im = jnp.where(eye, 0.0, jnp.maximum(margin + scores - d2, 0.0))
    if max_violation:
        cont = jnp.sum(jnp.max(cost_s, axis=1)) + jnp.sum(jnp.max(cost_im, axis=0))
    else:
        cont = jnp.sum(cost_s) + jnp.sum(cost_im)
    return 2.0 * simclr + cont


if __name__ == "__main__":
    temp, margin = 0.1, 0.2
    key = jax.random.PRNGKey(0)
    k1, k2 = jax.random.split(key)

    # Small case (B=8): single-tile path, both max_violation branches.
    B = 8
    scores = jax.random.normal(k1, (B, B), dtype=jnp.float32)
    for mv in (False, True):
        out = jax.block_until_ready(
            loss_sum(scores, temp=temp, margin=margin, max_violation=mv))
        ref = _reference_loss_sum(scores, temp, margin, mv)
        assert jnp.allclose(out, ref, rtol=1e-4, atol=1e-2), (mv, out, ref)

    # Multi-tile case (B=256, tiles of 64 -> grid (2, 2)): exercises the parallel axis,
    # online column logsumexp and the hinge partial accumulators across grid steps.
    B2 = 256
    scores2 = jax.random.normal(k2, (B2, B2), dtype=jnp.float32)
    for mv in (False, True):
        out = jax.block_until_ready(
            loss_sum(scores2, temp=temp, margin=margin, max_violation=mv, block_rows=64))
        ref = _reference_loss_sum(scores2, temp, margin, mv)
        assert jnp.allclose(out, ref, rtol=1e-3, atol=1e-1), (mv, out, ref)

    # Default (auto) tiling path as well.
    out = jax.block_until_ready(loss_sum(scores2, temp=temp, margin=margin))
    ref = _reference_loss_sum(scores2, temp, margin, False)
    assert jnp.allclose(out, ref, rtol=1e-3, atol=1e-1), (out, ref)

    print("KERNEL_OK")
</pallas_src>

<mosaic_0001>
module attributes {stable_mosaic.version = 11 : i64} {
  func.func @kernel(%arg0: i32, %arg1: i32, %arg2: memref<1x8xf32, #tpu.memory_space<vmem>>, %arg3: memref<8x1xf32, #tpu.memory_space<vmem>>, %arg4: memref<8x8xf32, #tpu.memory_space<vmem>>, %arg5: memref<1x1x1xf32, #tpu.memory_space<vmem>>, %arg6: memref<1x1x8xf32, #tpu.memory_space<vmem>>, %arg7: memref<1x1x1xf32, #tpu.memory_space<vmem>>, %arg8: memref<1x1x8xf32, #tpu.memory_space<vmem>>, %arg9: memref<1x1x8xf32, #tpu.memory_space<vmem>>) attributes {dimension_semantics = [#tpu.dimension_semantics<parallel>, #tpu.dimension_semantics<arbitrary>], iteration_bounds = array<i64: 1, 1>, scalar_prefetch = 0 : i64, scratch_operands = 0 : i64, tpu.core_type = #tpu.core_type<tc>, window_params = [{pipeline_mode = #tpu.pipeline_mode<synchronous>, transform_indices = @transform_0, window_bounds = array<i64: 1, 8>}, {transform_indices = @transform_1, window_bounds = array<i64: 8, 1>}, {transform_indices = @transform_2, window_bounds = array<i64: 8, 8>}, {transform_indices = @transform_3, window_bounds = array<i64: 1, 1, 1>}, {transform_indices = @transform_4, window_bounds = array<i64: 1, 1, 8>}, {transform_indices = @transform_5, window_bounds = array<i64: 1, 1, 1>}, {transform_indices = @transform_6, window_bounds = array<i64: 1, 1, 8>}, {transform_indices = @transform_7, window_bounds = array<i64: 1, 1, 8>}]} {
    %c0_i32 = arith.constant 0 : i32
    %0 = arith.cmpi eq, %arg1, %c0_i32 : i32
    %1 = arith.extui %0 : i1 to i32
    %c0_i32_0 = arith.constant 0 : i32
    %2 = arith.cmpi ne, %1, %c0_i32_0 : i32
    scf.if %2 {
      %cst_50 = arith.constant 0.000000e+00 : f32
      %76 = vector.broadcast %cst_50 : f32 to vector<1x1x1xf32>
      %c0_51 = arith.constant 0 : index
      %c0_52 = arith.constant 0 : index
      %c0_53 = arith.constant 0 : index
      %77 = vector.load %arg5[%c0_51, %c0_52, %c0_53] : memref<1x1x1xf32, #tpu.memory_space<vmem>>, vector<1x1x1xf32>
      tpu.vector_store %arg5[%c0_51, %c0_52, %c0_53], %76 {strides = array<i32>} : memref<1x1x1xf32, #tpu.memory_space<vmem>>, vector<1x1x1xf32>,
      %cst_54 = arith.constant 0.000000e+00 : f32
      %78 = vector.broadcast %cst_54 : f32 to vector<1x1x8xf32>
      %c0_55 = arith.constant 0 : index
      %c0_56 = arith.constant 0 : index
      %c0_57 = arith.constant 0 : index
      %79 = vector.load %arg6[%c0_55, %c0_56, %c0_57] : memref<1x1x8xf32, #tpu.memory_space<vmem>>, vector<1x1x8xf32>
      tpu.vector_store %arg6[%c0_55, %c0_56, %c0_57], %78 {strides = array<i32>} : memref<1x1x8xf32, #tpu.memory_space<vmem>>, vector<1x1x8xf32>,
      %cst_58 = arith.constant -1.000000e+30 : f32
      %80 = vector.broadcast %cst_58 : f32 to vector<1x1x1xf32>
      %c0_59 = arith.constant 0 : index
      %c0_60 = arith.constant 0 : index
      %c0_61 = arith.constant 0 : index
      %81 = vector.load %arg7[%c0_59, %c0_60, %c0_61] : memref<1x1x1xf32, #tpu.memory_space<vmem>>, vector<1x1x1xf32>
      tpu.vector_store %arg7[%c0_59, %c0_60, %c0_61], %80 {strides = array<i32>} : memref<1x1x1xf32, #tpu.memory_space<vmem>>, vector<1x1x1xf32>,
      %cst_62 = arith.constant 0.000000e+00 : f32
      %82 = vector.broadcast %cst_62 : f32 to vector<1x1x8xf32>
      %c0_63 = arith.constant 0 : index
      %c0_64 = arith.constant 0 : index
      %c0_65 = arith.constant 0 : index
      %83 = vector.load %arg8[%c0_63, %c0_64, %c0_65] : memref<1x1x8xf32, #tpu.memory_space<vmem>>, vector<1x1x8xf32>
      tpu.vector_store %arg8[%c0_63, %c0_64, %c0_65], %82 {strides = array<i32>} : memref<1x1x8xf32, #tpu.memory_space<vmem>>, vector<1x1x8xf32>,
      %cst_66 = arith.constant 0.000000e+00 : f32
      %84 = vector.broadcast %cst_66 : f32 to vector<1x1x8xf32>
      %c0_67 = arith.constant 0 : index
      %c0_68 = arith.constant 0 : index
      %c0_69 = arith.constant 0 : index
      %85 = vector.load %arg9[%c0_67, %c0_68, %c0_69] : memref<1x1x8xf32, #tpu.memory_space<vmem>>, vector<1x1x8xf32>
      tpu.vector_store %arg9[%c0_67, %c0_68, %c0_69], %84 {strides = array<i32>} : memref<1x1x8xf32, #tpu.memory_space<vmem>>, vector<1x1x8xf32>,
    } else {
    }
    %c0 = arith.constant 0 : index
    %c0_1 = arith.constant 0 : index
    %3 = vector.load %arg4[%c0, %c0_1] : memref<8x8xf32, #tpu.memory_space<vmem>>, vector<8x8xf32>
    %c0_2 = arith.constant 0 : index
    %c0_3 = arith.constant 0 : index
    %4 = vector.load %arg2[%c0_2, %c0_3] : memref<1x8xf32, #tpu.memory_space<vmem>>, vector<1x8xf32>
    %c0_4 = arith.constant 0 : index
    %c0_5 = arith.constant 0 : index
    %5 = vector.load %arg3[%c0_4, %c0_5] : memref<8x1xf32, #tpu.memory_space<vmem>>, vector<8x1xf32>
    %cst = arith.constant 1.000000e+00 : f32
    %6 = vector.broadcast %cst : f32 to vector<8x8xf32>
    %cst_6 = arith.constant 2.000000e-01 : f32
    %7 = vector.broadcast %cst_6 : f32 to vector<8x8xf32>
    %8 = arith.addf %3, %7 : vector<8x8xf32>
    %9 = vector.broadcast %5 : vector<8x1xf32> to vector<8x8xf32>
    %10 = arith.subf %8, %9 : vector<8x8xf32>
    %cst_7 = arith.constant 0.000000e+00 : f32
    %11 = vector.broadcast %cst_7 : f32 to vector<8x8xf32>
    %12 = arith.maximumf %10, %11 : vector<8x8xf32>
    %13 = vector.broadcast %4 : vector<1x8xf32> to vector<8x8xf32>
    %14 = arith.subf %8, %13 : vector<8x8xf32>
    %cst_8 = arith.constant 0.000000e+00 : f32
    %15 = vector.broadcast %cst_8 : f32 to vector<8x8xf32>
    %16 = arith.maximumf %14, %15 : vector<8x8xf32>
    %cst_9 = arith.constant dense<0.000000e+00> : vector<8x8xf32>
    %17 = tpu.matmul %6, %12, %cst_9 {dimension_numbers = #tpu.dot_dimension_numbers<[1], [0], [0], [1], [0, 0, 1, 1], [], []>, precision = #tpu.contract_precision<fp32>} : vector<8x8xf32>, vector<8x8xf32>, vector<8x8xf32> -> vector<8x8xf32>
    %18 = vector.extract_strided_slice %17 {offsets = [0, 0], sizes = [1, 8], strides = [1, 1]} : vector<8x8xf32> to vector<1x8xf32>
    %cst_10 = arith.constant dense<0.000000e+00> : vector<8x8xf32>
    %19 = tpu.matmul %6, %16, %cst_10 {dimension_numbers = #tpu.dot_dimension_numbers<[1], [0], [0], [1], [0, 0, 1, 1], [], []>, precision = #tpu.contract_precision<fp32>} : vector<8x8xf32>, vector<8x8xf32>, vector<8x8xf32> -> vector<8x8xf32>
    %20 = vector.extract_strided_slice %19 {offsets = [0, 0], sizes = [1, 8], strides = [1, 1]} : vector<8x8xf32> to vector<1x8xf32>
    %c0_11 = arith.constant 0 : index
    %c0_12 = arith.constant 0 : index
    %c0_13 = arith.constant 0 : index
    %21 = vector.load %arg8[%c0_11, %c0_12, %c0_13] : memref<1x1x8xf32, #tpu.memory_space<vmem>>, vector<1x1x8xf32>
    %22 = vector.shape_cast %18 : vector<1x8xf32> to vector<1x1x8xf32>
    %23 = arith.addf %21, %22 : vector<1x1x8xf32>
    %c0_14 = arith.constant 0 : index
    %c0_15 = arith.constant 0 : index
    %c0_16 = arith.constant 0 : index
    %24 = vector.load %arg8[%c0_14, %c0_15, %c0_16] : memref<1x1x8xf32, #tpu.memory_space<vmem>>, vector<1x1x8xf32>
    tpu.vector_store %arg8[%c0_14, %c0_15, %c0_16], %23 {strides = array<i32>} : memref<1x1x8xf32, #tpu.memory_space<vmem>>, vector<1x1x8xf32>,
    %c0_17 = arith.constant 0 : index
    %c0_18 = arith.constant 0 : index
    %c0_19 = arith.constant 0 : index
    %25 = vector.load %arg9[%c0_17, %c0_18, %c0_19] : memref<1x1x8xf32, #tpu.memory_space<vmem>>, vector<1x1x8xf32>
    %26 = vector.shape_cast %20 : vector<1x8xf32> to vector<1x1x8xf32>
    %27 = arith.addf %25, %26 : vector<1x1x8xf32>
    %c0_20 = arith.constant 0 : index
    %c0_21 = arith.constant 0 : index
    %c0_22 = arith.constant 0 : index
    %28 = vector.load %arg9[%c0_20, %c0_21, %c0_22] : memref<1x1x8xf32, #tpu.memory_space<vmem>>, vector<1x1x8xf32>
    tpu.vector_store %arg9[%c0_20, %c0_21, %c0_22], %27 {strides = array<i32>} : memref<1x1x8xf32, #tpu.memory_space<vmem>>, vector<1x1x8xf32>,
    %cst_23 = arith.constant dense<0xFF800000> : vector<8xf32>
    %29 = vector.multi_reduction <maximumf>, %3, %cst_23 [1] : vector<8x8xf32> to vector<8xf32>
    %30 = vector.shape_cast %29 : vector<8xf32> to vector<8x1xf32>
    %31 = vector.broadcast %30 : vector<8x1xf32> to vector<8x8xf32>
    %32 = arith.subf %3, %31 : vector<8x8xf32>
    %cst_24 = arith.constant 1.000000e+01 : f32
    %33 = vector.broadcast %cst_24 : f32 to vector<8x8xf32>
    %34 = arith.mulf %32, %33 : vector<8x8xf32>
    %35 = math.exp %34 : vector<8x8xf32>
    %cst_25 = arith.constant dense<0.000000e+00> : vector<8xf32>
    %36 = vector.multi_reduction <add>, %35, %cst_25 [1] : vector<8x8xf32> to vector<8xf32>
    %37 = vector.shape_cast %36 : vector<8xf32> to vector<8x1xf32>
    %38 = math.log %37 : vector<8x1xf32>
    %cst_26 = arith.constant 1.000000e+01 : f32
    %39 = vector.broadcast %cst_26 : f32 to vector<8x1xf32>
    %40 = arith.mulf %30, %39 : vector<8x1xf32>
    %41 = arith.addf %38, %40 : vector<8x1xf32>
    %c0_27 = arith.constant 0 : index
    %c0_28 = arith.constant 0 : index
    %c0_29 = arith.constant 0 : index
    %42 = vector.load %arg5[%c0_27, %c0_28, %c0_29] : memref<1x1x1xf32, #tpu.memory_space<vmem>>, vector<1x1x1xf32>
    %cst_30 = arith.constant 1.000000e+01 : f32
    %43 = vector.broadcast %cst_30 : f32 to vector<8x1xf32>
    %44 = arith.mulf %5, %43 : vector<8x1xf32>
    %45 = arith.subf %41, %44 : vector<8x1xf32>
    %cst_31 = arith.constant dense<0.000000e+00> : vector<1xf32>
    %46 = vector.multi_reduction <add>, %45, %cst_31 [0] : vector<8x1xf32> to vector<1xf32>
    %47 = vector.shape_cast %46 : vector<1xf32> to vector<1x1xf32>
    %48 = vector.shape_cast %47 : vector<1x1xf32> to vector<1x1x1xf32>
    %49 = arith.addf %42, %48 : vector<1x1x1xf32>
    %c0_32 = arith.constant 0 : index
    %c0_33 = arith.constant 0 : index
    %c0_34 = arith.constant 0 : index
    %50 = vector.load %arg5[%c0_32, %c0_33, %c0_34] : memref<1x1x1xf32, #tpu.memory_space<vmem>>, vector<1x1x1xf32>
    tpu.vector_store %arg5[%c0_32, %c0_33, %c0_34], %49 {strides = array<i32>} : memref<1x1x1xf32, #tpu.memory_space<vmem>>, vector<1x1x1xf32>,
    %cst_35 = arith.constant 1.000000e+01 : f32
    %51 = vector.broadcast %cst_35 : f32 to vector<8x1xf32>
    %52 = arith.mulf %30, %51 : vector<8x1xf32>
    %cst_36 = arith.constant dense<0xFF800000> : vector<1xf32>
    %53 = vector.multi_reduction <maximumf>, %52, %cst_36 [0] : vector<8x1xf32> to vector<1xf32>
    %54 = vector.shape_cast %53 : vector<1xf32> to vector<1x1xf32>
    %c0_37 = arith.constant 0 : index
    %c0_38 = arith.constant 0 : index
    %c0_39 = arith.constant 0 : index
    %55 = vector.load %arg7[%c0_37, %c0_38, %c0_39] : memref<1x1x1xf32, #tpu.memory_space<vmem>>, vector<1x1x1xf32>
    %56 = vector.shape_cast %55 : vector<1x1x1xf32> to vector<1x1xf32>
    %57 = arith.maximumf %56, %54 : vector<1x1xf32>
    %58 = vector.broadcast %57 : vector<1x1xf32> to vector<8x1xf32>
    %59 = arith.subf %52, %58 : vector<8x1xf32>
    %60 = math.exp %59 : vector<8x1xf32>
    %61 = vector.broadcast %60 : vector<8x1xf32> to vector<8x8xf32>
    %62 = arith.mulf %35, %61 : vector<8x8xf32>
    %cst_40 = arith.constant dense<0.000000e+00> : vector<8x8xf32>
    %63 = tpu.matmul %6, %62, %cst_40 {dimension_numbers = #tpu.dot_dimension_numbers<[1], [0], [0], [1], [0, 0, 1, 1], [], []>, precision = #tpu.contract_precision<fp32>} : vector<8x8xf32>, vector<8x8xf32>, vector<8x8xf32> -> vector<8x8xf32>
    %64 = vector.extract_strided_slice %63 {offsets = [0, 0], sizes = [1, 8], strides = [1, 1]} : vector<8x8xf32> to vector<1x8xf32>
    %c0_41 = arith.constant 0 : index
    %c0_42 = arith.constant 0 : index
    %c0_43 = arith.constant 0 : index
    %65 = vector.load %arg6[%c0_41, %c0_42, %c0_43] : memref<1x1x8xf32, #tpu.memory_space<vmem>>, vector<1x1x8xf32>
    %66 = vector.shape_cast %65 : vector<1x1x8xf32> to vector<1x8xf32>
    %67 = arith.subf %56, %57 : vector<1x1xf32>
    %68 = math.exp %67 : vector<1x1xf32>
    %69 = vector.broadcast %68 : vector<1x1xf32> to vector<1x8xf32>
    %70 = arith.mulf %66, %69 : vector<1x8xf32>
    %71 = arith.addf %70, %64 : vector<1x8xf32>
    %72 = vector.shape_cast %71 : vector<1x8xf32> to vector<1x1x8xf32>
    %c0_44 = arith.constant 0 : index
    %c0_45 = arith.constant 0 : index
    %c0_46 = arith.constant 0 : index
    %73 = vector.load %arg6[%c0_44, %c0_45, %c0_46] : memref<1x1x8xf32, #tpu.memory_space<vmem>>, vector<1x1x8xf32>
    tpu.vector_store %arg6[%c0_44, %c0_45, %c0_46], %72 {strides = array<i32>} : memref<1x1x8xf32, #tpu.memory_space<vmem>>, vector<1x1x8xf32>,
    %74 = vector.shape_cast %57 : vector<1x1xf32> to vector<1x1x1xf32>
    %c0_47 = arith.constant 0 : index
    %c0_48 = arith.constant 0 : index
    %c0_49 = arith.constant 0 : index
    %75 = vector.load %arg7[%c0_47, %c0_48, %c0_49] : memref<1x1x1xf32, #tpu.memory_space<vmem>>, vector<1x1x1xf32>
    tpu.vector_store %arg7[%c0_47, %c0_48, %c0_49], %74 {strides = array<i32>} : memref<1x1x1xf32, #tpu.memory_space<vmem>>, vector<1x1x1xf32>,
    return
  }
  func.func @transform_0(%arg0: i32, %arg1: i32) -> (i32, i32) {
    %c0_i32 = arith.constant 0 : i32
    %c0_i32_0 = arith.constant 0 : i32
    %c0_i32_1 = arith.constant 0 : i32
    return %c0_i32, %c0_i32_0 : i32, i32
  }
  func.func @transform_1(%arg0: i32, %arg1: i32) -> (i32, i32) {
    %c1_i32 = arith.constant 1 : i32
    %0 = arith.muli %arg0, %c1_i32 : i32
    %1 = arith.addi %0, %arg1 : i32
    %c0_i32 = arith.constant 0 : i32
    %c0_i32_0 = arith.constant 0 : i32
    return %1, %c0_i32 : i32, i32
  }
  func.func @transform_2(%arg0: i32, %arg1: i32) -> (i32, i32) {
    %c1_i32 = arith.constant 1 : i32
    %0 = arith.muli %arg0, %c1_i32 : i32
    %1 = arith.addi %0, %arg1 : i32
    %c0_i32 = arith.constant 0 : i32
    %c0_i32_0 = arith.constant 0 : i32
    return %1, %c0_i32 : i32, i32
  }
  func.func @transform_3(%arg0: i32, %arg1: i32) -> (i32, i32, i32) {
    %c0_i32 = arith.constant 0 : i32
    %c0_i32_0 = arith.constant 0 : i32
    %c0_i32_1 = arith.constant 0 : i32
    return %arg0, %c0_i32, %c0_i32_0 : i32, i32, i32
  }
  func.func @transform_4(%arg0: i32, %arg1: i32) -> (i32, i32, i32) {
    %c0_i32 = arith.constant 0 : i32
    %c0_i32_0 = arith.constant 0 : i32
    %c0_i32_1 = arith.constant 0 : i32
    return %arg0, %c0_i32, %c0_i32_0 : i32, i32, i32
  }
  func.func @transform_5(%arg0: i32, %arg1: i32) -> (i32, i32, i32) {
    %c0_i32 = arith.constant 0 : i32
    %c0_i32_0 = arith.constant 0 : i32
    %c0_i32_1 = arith.constant 0 : i32
    return %arg0, %c0_i32, %c0_i32_0 : i32, i32, i32
  }
  func.func @transform_6(%arg0: i32, %arg1: i32) -> (i32, i32, i32) {
    %c0_i32 = arith.constant 0 : i32
    %c0_i32_0 = arith.constant 0 : i32
    %c0_i32_1 = arith.constant 0 : i32
    return %arg0, %c0_i32, %c0_i32_0 : i32, i32, i32
  }
  func.func @transform_7(%arg0: i32, %arg1: i32) -> (i32, i32, i32) {
    %c0_i32 = arith.constant 0 : i32
    %c0_i32_0 = arith.constant 0 : i32
    %c0_i32_1 = arith.constant 0 : i32
    return %arg0, %c0_i32, %c0_i32_0 : i32, i32, i32
  }
}

</mosaic_0001>

<bundles_post_ra>
// kernel: loss_sum.1
= control target key start
LH: loop header
LB: loop body
LE: loop exit
PB: predicated region body
PF: predicated region fallthrough
CT: control target
= control target key end

     0   :  { %13 = vsyncpa [#allocation3], 0  ;;  %vm85_vm0 = vcmask 64512   ;;  %s1982_s0 = inlined_call_operand.vmem [shape: f32[1,8], index: 0, kind: input, shape index: {}]   ;;  %s1983_s1 = inlined_call_operand.vmem [shape: f32[8,1], index: 1, kind: input, shape index: {}]   ;;  %s1984_s2 = inlined_call_operand.vmem [shape: f32[8,8], index: 2, kind: input, shape index: {}]   ;;  %s1985_s3 = inlined_call_operand.hbm [shape: f32[1,1,1], index: 3, kind: output, shape index: {0}]   ;;  %s1986_s4 = inlined_call_operand.vmem [shape: f32[1,1,8], index: 4, kind: output, shape index: {1}]   ;;  %s1987_s5 = inlined_call_operand.hbm [shape: f32[1,1,1], index: 5, kind: output, shape index: {2}]   ;;  %s1988_s6 = inlined_call_operand.vmem [shape: f32[1,1,8], index: 6, kind: output, shape index: {3}]   ;;  %s1989_s7 = inlined_call_operand.vmem [shape: f32[1,1,8], index: 7, kind: output, shape index: {4}]  }
   0x1   :  { %v1801_v0 = vld [vmem:[%s1984_s2] sm:$0xff] }
   0x2   :  { %14 = vsyncpa [#allocation5], 0  ;;  %v988_v1 = vsel %vm85_vm0, %v1801_v0, -inf  ;;  %v1751_v2 = vmov 0   ;;  %vm59_vm1 = vcmask 0   ;;  %v1809_v4 = vld [vmem:[%s1983_s1] sm:$0xff]  ;;  %v1025_v12 = vlaneseq }
   0x3   :  { %1697 = vset.pattern.permute.xlu0 %v1751_v2  ;;  %1698 = vset.pattern.permute.xlu1 %v1751_v2  ;;  %v1752_v3 = vmov -1e+30   ;;  %v1753_v5 = vmov 0.0   ;;  %vm1754_vm2 = vmmov 0   ;;  %v87_v6 = vsel %vm85_vm0, 1.0, %v1751_v2  ;;  %s1756_s17 = smov [#allocation2]  }
   0x4   :  { %989 = vmax.xlane.f32.xlu0 %v988_v1  ;;  %63 = vst.msk [vmem:[#allocation4] sm:$0x1] %vm59_vm1, %v1752_v3  ;;  %1605 = vmatprep.subr.mxu1 %v1753_v5  ;;  %60 = vst.msk [vmem:[#allocation2] sm:$0x1] %vm59_vm1, %v1753_v5  ;;  %v1821_v7 = vsub.f32 %v87_v6, %v87_v6  ;;  %v69_v14 = vadd.f32 0.2, %v1801_v0 }
   0x5   :  { %1607 = vmatprep.mubr.msk.f32.mxu1 %vm1754_vm2, %v1753_v5  ;;  %1600 = vmatprep.subr.mxu0 %v1753_v5  ;;  %v1554_v15 = vld [vmem:[%s1982_s0] ss:$0 sm:$0xff]  ;;  %v1839_v19 = vshrl.u32 %v1025_v12, 7  ;;  %v1755_v41 = vmov 1.0   ;;  %vm61_vm3 = vcmask 57344   ;;  %vm1005_vm4 = vcmask 7168  }
   0x6   :  { %1602 = vmatprep.mubr.msk.f32.mxu0 %vm1754_vm2, %v1753_v5  ;;  %v1830_v11 = vand.u32 4294901760, %v1821_v7  ;;  %v83_v22 = vsub.f32 %v69_v14, %v1554_v15  ;;  %62 = vst.msk [vmem:[%s1986_s4] sm:$0x1] %vm61_vm3, %v1753_v5  ;;  %64 = vst.msk [vmem:[%s1988_s6] sm:$0x1] %vm61_vm3, %v1753_v5  ;;  %s1508_s18 = sshll.u32 %s1756_s17, 4  ;;  %s1509_s18 = int_to_ptr.vmem [resolvable:$true] %s1508_s18 }
   0x7   :  { %v1027_v27 = vsub.s32 0, %v1839_v19  ;;  %65 = vst.msk [vmem:[%s1989_s7] sm:$0x1] %vm61_vm3, %v1753_v5  ;;  %s1757_s19 = smov [#allocation4]   ;;  %s1707_s21 = scalar_lea.vmem %s1509_s18, 16 }
   0x8   :  { %v158_v18 = vsub.f32 %v1821_v7, %v1830_v11  ;;  %v84_v29 = vmax.f32 %v83_v22, 0.0  ;;  %s1520_s20 = sshll.u32 %s1757_s19, 4  ;;  %p1708_p0 = scmp.ne.s32.totalorder %s1509_s18, %s1707_s21  ;;  %s1521_s20 = int_to_ptr.vmem [resolvable:$true] %s1520_s20 }
   0x9   :  { %s1711_s22 = scalar_lea.vmem %s1509_s18, 32  ;;  %p1712_p1 = scmp.lt.s32.totalorder %s1509_s18, %s1509_s18 }
   0xa   :  { %v1843_v26 = vand.u32 4294901760, %v158_v18  ;;  %v566_v34 = vand.u32 4294901760, %v84_v29  ;;  %p1713_p2 = scmp.lt.s32.totalorder %s1711_s22, %s1707_s21 }
   0xb   :  { %v1841_v25 = vld [vmem:[#allocation4] sm:$0x1] }
   0xc   :  { %v643_v39 = vsub.f32 %v84_v29, %v566_v34  ;;  %p1714_p3 = por %p1713_p2, %p1712_p1 }
   0xe   :  { %v644_v42 = vand.u32 4294901760, %v643_v39  ;;  %p1715_p4 = pnand %p1714_p3, %p1708_p0 }
  0x10   :  { %v645_v43 = vsub.f32 %v643_v39, %v644_v42 }
  0x12   :  { %v646_v44 = vand.u32 4294901760, %v645_v43 }
  0x1a   :  { %72 = vperm.xlu0 %1697, %v1809_v4  }
  0x8d   :  { %v1823_v8 = vpop.xlane.xlu0 %989 }
  0x8e   :  { %v1826_v9 = vmul.f32 10.0, %v1823_v8  ;;  %v991_v46 = vsub.f32 %v1801_v0, %v1823_v8 }
  0x90   :  { %v1016_v10 = vrot.slane %v1826_v9, 4  ;;  %v992_v47 = vmul.f32 10.0, %v991_v46 }
  0x92   :  { %v1017_v13 = vmax.f32 %v1826_v9, %v1016_v10  ;;  %v993_v48 = vmul.f32 1.442695, %v992_v47 }
  0x94   :  { %v1018_v16 = vrot.slane %v1017_v13, 2 }
  0x95   :  { %v73_v17 = vpop.permute.xlu0 %72 }
  0x96   :  { %v1019_v20 = vmax.f32 %v1017_v13, %v1018_v16  ;;  %v75_v21 = vsub.f32 %v69_v14, %v73_v17  ;;  %v981_v17 = vld [vmem:[%s1988_s6] sm:$0x1] }
  0x98   :  { %v1020_v23 = vrot.slane %v1019_v20, 1  ;;  %v76_v24 = vmax.f32 %v75_v21, 0.0 }
  0x9a   :  { %v1021_v28 = vmax.f32 %v1019_v20, %v1020_v23  ;;  %v120_v30 = vand.u32 4294901760, %v76_v24  ;;  %v1003_v20 = vmul.f32 10.0, %v1809_v4 }
  0x9c   :  { %v1847_v31 = vmax.f32 %v1841_v25, %v1021_v28  ;;  %v197_v32 = vsub.f32 %v76_v24, %v120_v30  ;;  %1601 = vmatpush3.msra.mxu0 %v120_v30 }
  0x9d   :  { %1603 = vmatmul.mubr.f32.vlgmr.msra.gmra.mxu0 %v1843_v26  ;;  %1610 = vmatprep.subr.mxu0 %v1753_v5 }
  0x9e   :  { %v1028_v33 = vrot.slane %v1847_v31, %v1027_v27  ;;  %1501 = vst.msk [vmem:[#allocation4] sm:$0x1] %vm59_vm1, %v1847_v31  ;;  %v198_v35 = vand.u32 4294901760, %v197_v32  ;;  %1611 = vmatpush3.msra.mxu0 %v197_v32  ;;  %1612 = vmatprep.mubr.msk.f32.mxu0 %vm1754_vm2, %v1753_v5  ;;  %v1486_v49 = vsub.f32 %v1841_v25, %v1847_v31 }
  0x9f   :  { %1620 = vmatprep.subr.mxu0 %v1753_v5 }
  0xa0   :  { %v1030_v36 = vsub.f32 %v1826_v9, %v1028_v33  ;;  %v199_v37 = vsub.f32 %v197_v32, %v198_v35  ;;  %v1487_v51 = vmul.f32 1.442695, %v1486_v49  ;;  %v1002_v49 = vld [vmem:[#allocation2] sm:$0x1] }
  0xa1   :  { %1613 = vmatmul.mubr.f32.vlgmr.msra.gmra.mxu0 %v1821_v7 }
  0xa2   :  { %v1031_v38 = vmul.f32 1.442695, %v1030_v36  ;;  %v200_v40 = vand.u32 4294901760, %v199_v37  ;;  %1621 = vmatpush3.msra.mxu0 %v198_v35  ;;  %1622 = vmatprep.mubr.msk.f32.mxu0 %vm1754_vm2, %v1753_v5 }
  0xa3   :  { %1630 = vmatprep.subr.mxu0 %v1753_v5 }
  0xa4   :  { %1699 = vpow2.f32 %v1031_v38  ;;  %1606 = vmatpush3.msra.mxu1 %v200_v40 }
  0xa5   :  { %1608 = vmatmul.mubr.msk.f32.vlgmr.msra.gmra.mxu1 %vm85_vm0, %v1755_v41  ;;  %1615 = vmatprep.subr.mxu1 %v1753_v5  ;;  %1701 = vpow2.f32 %v993_v48 }
  0xa6   :  { %1616 = vmatpush3.msra.mxu1 %v120_v30  ;;  %1617 = vmatprep.mubr.msk.f32.mxu1 %vm1754_vm2, %v1753_v5  ;;  %1703 = vpow2.f32 %v1487_v51 }
  0xa7   :  { %1625 = vmatprep.subr.mxu1 %v1753_v5  ;;  %1623 = vmatmul.mubr.msk.f32.vlgmr.msra.gmra.mxu0 %vm85_vm0, %v1755_v41 }
  0xa8   :  { %1631 = vmatpush3.msra.mxu0 %v566_v34  ;;  %1632 = vmatprep.mubr.msk.f32.mxu0 %vm1754_vm2, %v1753_v5 }
  0xa9   :  { %1618 = vmatmul.mubr.f32.vlgmr.msra.gmra.mxu1 %v1830_v11  ;;  %1640 = vmatprep.subr.mxu0 %v1753_v5 }
  0xaa   :  { %1626 = vmatpush3.msra.mxu1 %v120_v30  ;;  %1627 = vmatprep.mubr.msk.f32.mxu1 %vm1754_vm2, %v1753_v5 }
  0xab   :  { %1633 = vmatmul.mubr.f32.vlgmr.msra.gmra.mxu0 %v1843_v26  ;;  %1635 = vmatprep.subr.mxu1 %v1753_v5 }
  0xac   :  { %1641 = vmatpush3.msra.mxu0 %v643_v39  ;;  %1642 = vmatprep.mubr.msk.f32.mxu0 %vm1754_vm2, %v1753_v5 }
  0xad   :  { %1628 = vmatmul.mubr.msk.f32.vlgmr.msra.gmra.mxu1 %vm85_vm0, %v1755_v41  ;;  %1650 = vmatprep.subr.mxu0 %v1753_v5 }
  0xae   :  { %1636 = vmatpush3.msra.mxu1 %v646_v44  ;;  %1637 = vmatprep.mubr.msk.f32.mxu1 %vm1754_vm2, %v1753_v5 }
  0xaf   :  { %1643 = vmatmul.mubr.f32.vlgmr.msra.gmra.mxu0 %v1821_v7  ;;  %1645 = vmatprep.subr.mxu1 %v1753_v5 }
  0xb0   :  { %1651 = vmatpush3.msra.mxu0 %v644_v42  ;;  %1652 = vmatprep.mubr.msk.f32.mxu0 %vm1754_vm2, %v1753_v5  ;;  %v985_v42 = vld [vmem:[%s1989_s7] sm:$0x1] }
  0xb1   :  { %v1700_v45 = vpop.eup %1699  ;;  %1638 = vmatmul.mubr.msk.f32.vlgmr.msra.gmra.mxu1 %vm85_vm0, %v1755_v41  ;;  %1660 = vmatprep.subr.mxu0 %v1753_v5 }
  0xb2   :  { %1035 = vperm.xlu1 %1698, %v1700_v45   ;;  %1646 = vmatpush3.msra.mxu1 %v566_v34  ;;  %v1702_v50 = vpop.eup %1701 }
  0xb3   :  { %1653 = vmatmul.mubr.msk.f32.vlgmr.msra.gmra.mxu0 %vm85_vm0, %v1755_v41  ;;  %1647 = vmatprep.mubr.msk.f32.mxu1 %vm1754_vm2, %v1753_v5  ;;  %v995_v52 = vsel %vm85_vm0, %v1702_v50, 0.0  ;;  %v1704_v53 = vpop.eup %1703 }
  0xb4   :  { %1662 = vmatprep.mubr.msk.f32.mxu0 %vm1754_vm2, %v1753_v5  ;;  %1655 = vmatprep.subr.mxu1 %v1753_v5 }
  0xb5   :  { %1648 = vmatmul.mubr.f32.vlgmr.msra.gmra.mxu1 %v1830_v11 }
  0xb6   :  { %1656 = vmatpush3.msra.mxu1 %v566_v34  ;;  %1657 = vmatprep.mubr.msk.f32.mxu1 %vm1754_vm2, %v1753_v5 }
  0xb7   :  { %1665 = vmatprep.subr.mxu1 %v1753_v5 }
  0xb9   :  { %1658 = vmatmul.mubr.msk.f32.vlgmr.msra.gmra.mxu1 %vm85_vm0, %v1755_v41 }
  0xba   :  { %1667 = vmatprep.mubr.msk.f32.mxu1 %vm1754_vm2, %v1753_v5 }
  0xd6   :  { %996 = vadd.xlane.f32.xlu1 %v995_v52 }
  0xe7   :  { %1491 = vperm.xlu1 %1698, %v1704_v53  }
 0x12d   :  { %v1036_v54 = vpop.permute.xlu1 %1035 }
 0x12e   :  { %v1038_v55 = vmul.f32 %v1702_v50, %v1036_v54 }
 0x130   :  { %v1070_v56 = vand.u32 4294901760, %v1038_v55 }
 0x132   :  { %v1147_v57 = vsub.f32 %v1038_v55, %v1070_v56  ;;  %1661 = vmatpush3.msra.mxu0 %v1070_v56 }
 0x133   :  { %1663 = vmatmul.mubr.f32.vlgmr.msra.gmra.mxu0 %v1843_v26  ;;  %1670 = vmatprep.subr.mxu0 %v1753_v5 }
 0x134   :  { %v1148_v58 = vand.u32 4294901760, %v1147_v57  ;;  %1671 = vmatpush3.msra.mxu0 %v1147_v57  ;;  %1672 = vmatprep.mubr.msk.f32.mxu0 %vm1754_vm2, %v1753_v5 }
 0x135   :  { %1680 = vmatprep.subr.mxu0 %v1753_v5 }
 0x136   :  { %v1149_v59 = vsub.f32 %v1147_v57, %v1148_v58 }
 0x137   :  { %1673 = vmatmul.mubr.f32.vlgmr.msra.gmra.mxu0 %v1821_v7 }
 0x138   :  { %1681 = vmatpush3.msra.mxu0 %v1148_v58  ;;  %v1150_v60 = vand.u32 4294901760, %v1149_v59  ;;  %1682 = vmatprep.mubr.msk.f32.mxu0 %vm1754_vm2, %v1753_v5 }
 0x13a   :  { %1666 = vmatpush3.msra.mxu1 %v1150_v60 }
 0x13b   :  { %1668 = vmatmul.mubr.msk.f32.vlgmr.msra.gmra.mxu1 %vm85_vm0, %v1755_v41  ;;  %1675 = vmatprep.subr.mxu1 %v1753_v5 }
 0x13c   :  { %1676 = vmatpush3.msra.mxu1 %v1070_v56  ;;  %1677 = vmatprep.mubr.msk.f32.mxu1 %vm1754_vm2, %v1753_v5 }
 0x13d   :  { %1685 = vmatprep.subr.mxu1 %v1753_v5  ;;  %1683 = vmatmul.mubr.msk.f32.vlgmr.msra.gmra.mxu0 %vm85_vm0, %v1755_v41 }
 0x13f   :  { %1678 = vmatmul.mubr.f32.vlgmr.msra.gmra.mxu1 %v1830_v11 }
 0x140   :  { %1686 = vmatpush3.msra.mxu1 %v1070_v56  ;;  %1687 = vmatprep.mubr.msk.f32.mxu1 %vm1754_vm2, %v1753_v5 }
 0x143   :  { %1688 = vmatmul.mubr.msk.f32.vlgmr.msra.gmra.mxu1 %vm85_vm0, %v1755_v41 }
 0x15d   :  { %v161_v61 = vpop.f32.mrf.mxu0 }
 0x15f   :  { %v997_v62 = vpop.xlane.xlu1 %996  ;;  %v1604_v63 = vpop.f32.mrf.mxu0 }
 0x160   :  { %1705 = vlog2.f32 %v997_v62 }
 0x161   :  { %v311_v0 = vpop.f32.mrf.mxu0 }
 0x163   :  { %v1614_v1 = vpop.f32.mrf.mxu0 }
 0x165   :  { %v237_v2 = vpop.f32.mrf.mxu1 }
 0x166   :  { %v238_v3 = vadd.f32 %v237_v2, %v161_v61 }
 0x167   :  { %v1609_v6 = vpop.f32.mrf.mxu1  ;;  %v459_v7 = vpop.f32.mrf.mxu0 }
 0x168   :  { %v312_v8 = vadd.f32 %v311_v0, %v238_v3 }
 0x169   :  { %v385_v10 = vpop.f32.mrf.mxu1  ;;  %v1624_v11 = vpop.f32.mrf.mxu0 }
 0x16a   :  { %v386_v12 = vadd.f32 %v385_v10, %v312_v8 }
 0x16b   :  { %v1619_v13 = vpop.f32.mrf.mxu1  ;;  %v607_v14 = vpop.f32.mrf.mxu0 }
 0x16c   :  { %v460_v5 = vadd.f32 %v459_v7, %v386_v12 }
 0x16d   :  { %v1706_v15 = vpop.eup %1705  ;;  %v531_v16 = vpop.f32.mrf.mxu1 }
 0x16e   :  { %v1634_v18 = vpop.f32.mrf.mxu0  ;;  %v999_v21 = vmul.f32 0.6931472, %v1706_v15  ;;  %v532_v22 = vadd.f32 %v531_v16, %v460_v5 }
 0x16f   :  { %v1629_v23 = vpop.f32.mrf.mxu1 }
 0x170   :  { %v757_v24 = vpop.f32.mrf.mxu0  ;;  %v1001_v25 = vadd.f32 %v1826_v9, %v999_v21  ;;  %v982_v26 = vadd.f32 %v981_v17, %v532_v22 }
 0x171   :  { %v683_v28 = vpop.f32.mrf.mxu1 }
 0x172   :  { %v1644_v29 = vpop.f32.mrf.mxu0  ;;  %v1004_v30 = vsub.f32 %v1001_v25, %v1003_v20  ;;  %984 = vst.msk [vmem:[%s1988_s6] sm:$0x1] %vm61_vm3, %v982_v26  ;;  %v684_v31 = vadd.f32 %v683_v28, %v607_v14 }
 0x173   :  { %v1639_v32 = vpop.f32.mrf.mxu1 }
 0x174   :  { %v905_v33 = vpop.f32.mrf.mxu0  ;;  %v1006_v4 = vsel %vm1005_vm4, %v1004_v30, 0.0  ;;  %v758_v34 = vadd.f32 %v757_v24, %v684_v31 }
 0x175   :  { %v1007_v35 = vrot.slane %v1006_v4, 4  ;;  %v831_v36 = vpop.f32.mrf.mxu1 }
 0x176   :  { %v1654_v37 = vpop.f32.mrf.mxu0  ;;  %v832_v38 = vadd.f32 %v831_v36, %v758_v34 }
 0x177   :  { %v1008_v9 = vadd.f32 %v1007_v35, %v1006_v4  ;;  %v1649_v39 = vpop.f32.mrf.mxu1 }
 0x178   :  { %v906_v40 = vadd.f32 %v905_v33, %v832_v38 }
 0x179   :  { %v977_v41 = vpop.f32.mrf.mxu1  ;;  %v1009_v43 = vrot.slane %v1008_v9, 2 }
 0x17a   :  { %v978_v44 = vadd.f32 %v977_v41, %v906_v40 }
 0x17b   :  { %v1659_v45 = vpop.f32.mrf.mxu1  ;;  %v1010_v46 = vadd.f32 %v1009_v43, %v1008_v9 }
 0x17c   :  { %v986_v47 = vadd.f32 %v985_v42, %v978_v44 }
 0x17d   :  { %v1011_v48 = vrot.slane %v1010_v46, 1 }
 0x17e   :  { %987 = vst.msk [vmem:[%s1989_s7] sm:$0x1] %vm61_vm3, %v986_v47 }
 0x17f   :  { %v1012_v50 = vadd.f32 %v1011_v48, %v1010_v46 }
 0x181   :  { %v1013_v51 = vadd.f32 %v1012_v50, %v1002_v49 }
 0x183   :  { %1015 = vst.msk [vmem:[#allocation2] sm:$0x1] %vm59_vm1, %v1013_v51 }
 0x184   :  { %1718 = shalt.err (!%p1715_p4)
}
 0x185   :  { %1511 = dma.vmem_to_hbm [thread:$0]  %s1509_s18, 16, %s1985_s3, [#allocation3]  }
 0x186   :  { %s1727_s24 = scalar_lea.vmem %s1521_s20, 16  ;;  %s1731_s25 = scalar_lea.vmem %s1521_s20, 32 }
 0x187   :  { %p1728_p5 = scmp.ne.s32.totalorder %s1521_s20, %s1727_s24  ;;  %p1732_p6 = scmp.lt.s32.totalorder %s1521_s20, %s1521_s20 }
 0x188   :  { %p1733_p7 = scmp.lt.s32.totalorder %s1731_s25, %s1727_s24 }
 0x18a   :  { %p1734_p8 = por %p1733_p7, %p1732_p6 }
 0x18c   :  { %p1735_p9 = pnand %p1734_p8, %p1728_p5 }
 0x18e   :  { %1738 = shalt.err (!%p1735_p9)
}
 0x18f   :  { %1523 = dma.vmem_to_hbm [thread:$0]  %s1521_s20, 16, %s1987_s5, [#allocation5]   ;;  %v1492_v57 = vpop.permute.xlu1 %1491  ;;  %v1485_v2 = vld [vmem:[%s1986_s4] sm:$0x1] }
 0x190   :  { %v1497_v0 = vrot.slane %v1492_v57, %v1027_v27 }
 0x192   :  { %v1498_v8 = vmul.f32 %v1497_v0, %v1485_v2 }
 0x1f3   :  { %v1111_v52 = vpop.f32.mrf.mxu0 }
 0x1f5   :  { %v1664_v53 = vpop.f32.mrf.mxu0 }
 0x1f7   :  { %v1261_v54 = vpop.f32.mrf.mxu0 }
 0x1f9   :  { %v1674_v55 = vpop.f32.mrf.mxu0 }
 0x1fb   :  { %v1187_v56 = vpop.f32.mrf.mxu1 }
 0x1fc   :  { %v1188_v58 = vadd.f32 %v1187_v56, %v1111_v52 }
 0x1fd   :  { %v1669_v59 = vpop.f32.mrf.mxu1  ;;  %v1409_v60 = vpop.f32.mrf.mxu0 }
 0x1fe   :  { %v1262_v61 = vadd.f32 %v1261_v54, %v1188_v58 }
 0x1ff   :  { %v1335_v62 = vpop.f32.mrf.mxu1  ;;  %v1684_v63 = vpop.f32.mrf.mxu0 }
 0x200   :  { %v1336_v1 = vadd.f32 %v1335_v62, %v1262_v61 }
 0x201   :  { %v1679_v3 = vpop.f32.mrf.mxu1 }
 0x202   :  { %v1410_v6 = vadd.f32 %v1409_v60, %v1336_v1 }
 0x203   :  { %v1481_v7 = vpop.f32.mrf.mxu1 }
 0x204   :  { %v1482_v10 = vadd.f32 %v1481_v7, %v1410_v6 }
 0x205   :  { %v1689_v11 = vpop.f32.mrf.mxu1 }
 0x206   :  { %v1499_v12 = vadd.f32 %v1498_v8, %v1482_v10 }
 0x208   :  { %1500 = vst.msk [vmem:[%s1986_s4] sm:$0x1] %vm61_vm3, %v1499_v12 }
 0x209   :  { %1747 = dma.done.wait [#allocation3], 16  }
 0x20a   :  { %1748 = vsyncadd [#allocation3], 4294967280 }
 0x20b   :  { %1749 = dma.done.wait [#allocation5], 16  }
 0x20c   :  { %1750 = vsyncadd [#allocation5], 4294967280 }
 0x20d   :  { %1540 = vsyncpa [#allocation3], 1 }
 0x20e   :  { %1541 = vsyncpa [#allocation5], 1 }

</bundles_post_ra>
